<compile_context>
chip_gen: v7x
topology: tpu7x:2x2x1
jax: 0.10.0
libtpu: 0.0.40
codegen_flags: <defaults>
</compile_context>

<pallas_src>
import jax
import jax.numpy as jnp
from jax.experimental import pallas as pl
from jax.experimental.pallas import tpu as pltpu


def cnn_kernel(x2_ref, wblk_ref, wf2_ref, bf_ref, out_ref):
    # x2:   (2, Bt, Lp*C*K)  bf16 im2col patches; axis 0 = even/odd conv position,
    #                        lane j = p*(C*K) + (c*K + k)
    # wblk: (Lp*C*K, Lp*Cout) bf16 block-diagonal conv weight (out lane = p*Cout + co)
    # wf2:  (Lp*Cout, OUT)    bf16 fc weight reordered to lane order p*Cout + co
    # bf:   (1, OUT)          f32 fc bias with conv bias folded in
    wblk = wblk_ref[...]
    # Conv1d at the even / odd conv positions: two (Bt,72)@(72,512) MXU matmuls whose
    # output lanes are already in fc-input order.  f32 accumulation.
    conv_e = jnp.dot(x2_ref[0], wblk, preferred_element_type=jnp.float32)  # (Bt, 512)
    conv_o = jnp.dot(x2_ref[1], wblk, preferred_element_type=jnp.float32)  # (Bt, 512)
    # MaxPool1d(2): elementwise max of the two halves (pure VPU, full 512-lane rows).
    pooled = jnp.maximum(conv_e, conv_o).astype(jnp.bfloat16)              # (Bt, 512)
    # Linear(512 -> 384): single 512-deep MXU contraction, f32 accumulation.
    out = jnp.dot(pooled, wf2_ref[...], preferred_element_type=jnp.float32)  # (Bt, 384)
    out_ref[...] = (out + bf_ref[...]).astype(out_ref.dtype)


def prepare_params(wc, bc, wf, bf):
    """One-time parameter prep (hoisted out of the per-call path)."""
    Cout, C, K = wc.shape                                  # (64, 3, 3)
    OUT, FC_IN = wf.shape                                  # (384, 512)
    Lp = FC_IN // Cout                                     # 8
    CK = C * K                                             # 9
    wc2 = jnp.asarray(wc, jnp.float32).reshape(Cout, CK).T          # (9, 64)  [ck, co]
    # Block-diagonal conv weight: wblk[p*9+ck, p*64+co] = wc2[ck, co], zero elsewhere.
    wblk = jnp.kron(jnp.eye(Lp, dtype=jnp.float32), wc2)            # (72, 512)
    # fc weight: PyTorch flat index is co*Lp + p; reorder so input lane = p*Cout + co.
    wf2 = (jnp.asarray(wf, jnp.float32)
           .reshape(OUT, Cout, Lp).transpose(2, 1, 0)
           .reshape(Lp * Cout, OUT))                                # (512, 384)
    # Fold the per-channel conv bias (constant per lane p*64+co, commutes with MaxPool).
    bc_lane = jnp.tile(jnp.asarray(bc, jnp.float32), Lp)            # (512,) -> bc[co]
    bf_fold = (jnp.asarray(bf, jnp.float32) + bc_lane @ wf2).reshape(1, OUT)
    return wblk.astype(jnp.bfloat16), wf2.astype(jnp.bfloat16), bf_fold


@jax.jit
def cnn_forward(x, wblk, wf2, bf_fold):
    """x: (B, 3, L) f32 in PyTorch NCL layout; prepared params from prepare_params()."""
    B, C, L = x.shape
    CKLp, COLp = wblk.shape                               # 72, 512
    OUT = wf2.shape[1]
    K = 3
    CK = C * K
    Lp = CKLp // CK
    assert L == 2 * Lp, "MaxPool1d(2) + fc(64*8) implies L = 16 (even)"

    # --- glue: im2col via three static shifted slices (no gather) + even/odd split ---
    x_pad = jnp.pad(x, ((0, 0), (0, 0), (1, 1)))                       # (B, C, L+2)
    taps = jnp.stack([x_pad[:, :, k:k + L] for k in range(K)], axis=-1)  # (B, C, L, K)
    patches = jnp.transpose(taps, (0, 2, 1, 3)).reshape(B, L, CK)      # (B, L, C*K)
    patches = patches.reshape(B, Lp, 2, CK)                            # [b, p, e, ck]
    x2 = jnp.transpose(patches, (2, 0, 1, 3)).reshape(2, B, Lp * CK)   # [e, b, p*9+ck]
    x2 = x2.astype(jnp.bfloat16)

    # --- batch-tiled grid; weights stay resident across tiles ---
    # Bt multiple of 8 at production batch (use ~128 on v5e); toy B < 8 uses the full batch.
    Bt = B if B <= 256 else 256
    assert B % Bt == 0  # TODO(synk): pad batch or rely on Pallas boundary masking otherwise
    grid = (pl.cdiv(B, Bt),)

    return pl.pallas_call(
        cnn_kernel,
        out_shape=jax.ShapeDtypeStruct((B, OUT), jnp.float32),
        grid=grid,
        in_specs=[
            pl.BlockSpec((2, Bt, CKLp), lambda i: (0, i, 0)),   # batch-tiled patches
            pl.BlockSpec(wblk.shape, lambda i: (0, 0)),         # resident conv weight
            pl.BlockSpec(wf2.shape, lambda i: (0, 0)),          # resident fc weight
            pl.BlockSpec(bf_fold.shape, lambda i: (0, 0)),      # resident folded bias
        ],
        out_specs=pl.BlockSpec((Bt, OUT), lambda i: (i, 0)),
        compiler_params=pltpu.CompilerParams(
            dimension_semantics=("parallel",)),                 # v7x: 2 TCs split batch
    )(x2, wblk, wf2, bf_fold)


def reference_forward(x, wc, bc, wf, bf):
    """Pure-JAX f32 reference reproducing the PyTorch forward exactly."""
    conv = jax.lax.conv_general_dilated(
        x, wc, window_strides=(1,), padding=((1, 1),),
        dimension_numbers=("NCH", "OIH", "NCH"))                     # (B, 64, 16)
    conv = conv + bc[None, :, None]
    B, Cout, L = conv.shape
    pooled = jnp.max(conv.reshape(B, Cout, L // 2, 2), axis=3)       # (B, 64, 8)
    flat = pooled.reshape(B, Cout * (L // 2))                        # (B, 512) channel-major
    return flat @ wf.T + bf[None, :]


if __name__ == "__main__":
    key = jax.random.PRNGKey(0)
    kx, k1, k2, k3, k4 = jax.random.split(key, 5)

    B, C, L = 2, 3, 16         # forward implies L=16 so 64 * (L/2) == 512 == fc in-features
    Cout, K = 64, 3
    fc_in, fc_out = Cout * (L // 2), 384

    x = jax.random.normal(kx, (B, C, L), dtype=jnp.float32)

    # Deterministic synthetic parameters (shapes from the module's __init__).
    wc = 0.1 * jax.random.normal(k1, (Cout, C, K), dtype=jnp.float32)
    bc = 0.1 * jax.random.normal(k2, (Cout,), dtype=jnp.float32)
    wf = 0.05 * jax.random.normal(k3, (fc_out, fc_in), dtype=jnp.float32)
    bf = 0.05 * jax.random.normal(k4, (fc_out,), dtype=jnp.float32)

    # One-time parameter prep (hoisted out of the per-call path).
    wblk, wf2, bf_fold = prepare_params(wc, bc, wf, bf)
    wblk, wf2, bf_fold = jax.block_until_ready((wblk, wf2, bf_fold))

    out = cnn_forward(x, wblk, wf2, bf_fold)
    out = jax.block_until_ready(out)

    ref = reference_forward(x, wc, bc, wf, bf)
    assert out.shape == (B, fc_out), out.shape
    # bf16 weights/activations with f32 accumulation -> relaxed tolerance vs f32 reference.
    assert jnp.allclose(out, ref, atol=2e-2, rtol=2e-2), float(jnp.max(jnp.abs(out - ref)))

    print("KERNEL_OK")
</pallas_src>

<mosaic_0001>
module attributes {stable_mosaic.version = 11 : i64} {
  func.func @cnn_kernel(%arg0: i32, %arg1: memref<2x2x72xbf16, #tpu.memory_space<vmem>>, %arg2: memref<72x512xbf16, #tpu.memory_space<vmem>>, %arg3: memref<512x384xbf16, #tpu.memory_space<vmem>>, %arg4: memref<1x384xf32, #tpu.memory_space<vmem>>, %arg5: memref<2x384xf32, #tpu.memory_space<vmem>>) attributes {dimension_semantics = [#tpu.dimension_semantics<parallel>], iteration_bounds = array<i64: 1>, scalar_prefetch = 0 : i64, scratch_operands = 0 : i64, tpu.core_type = #tpu.core_type<tc>, window_params = [{transform_indices = @transform_0, window_bounds = array<i64: 2, 2, 72>}, {pipeline_mode = #tpu.pipeline_mode<synchronous>, transform_indices = @transform_1, window_bounds = array<i64: 72, 512>}, {pipeline_mode = #tpu.pipeline_mode<synchronous>, transform_indices = @transform_2, window_bounds = array<i64: 512, 384>}, {pipeline_mode = #tpu.pipeline_mode<synchronous>, transform_indices = @transform_3, window_bounds = array<i64: 1, 384>}, {transform_indices = @transform_4, window_bounds = array<i64: 2, 384>}]} {
    %c0 = arith.constant 0 : index
    %c0_0 = arith.constant 0 : index
    %0 = vector.load %arg2[%c0, %c0_0] : memref<72x512xbf16, #tpu.memory_space<vmem>>, vector<72x512xbf16>
    %c0_1 = arith.constant 0 : index
    %c0_2 = arith.constant 0 : index
    %c0_3 = arith.constant 0 : index
    %1 = vector.load %arg1[%c0_1, %c0_2, %c0_3] : memref<2x2x72xbf16, #tpu.memory_space<vmem>>, vector<1x2x72xbf16>
    %2 = vector.shape_cast %1 : vector<1x2x72xbf16> to vector<2x72xbf16>
    %cst = arith.constant dense<0.000000e+00> : vector<2x512xf32>
    %3 = tpu.matmul %2, %0, %cst {dimension_numbers = #tpu.dot_dimension_numbers<[1], [0], [0], [1], [0, 0, 1, 1], [], []>} : vector<2x72xbf16>, vector<72x512xbf16>, vector<2x512xf32> -> vector<2x512xf32>
    %c1 = arith.constant 1 : index
    %c0_4 = arith.constant 0 : index
    %c0_5 = arith.constant 0 : index
    %4 = vector.load %arg1[%c1, %c0_4, %c0_5] : memref<2x2x72xbf16, #tpu.memory_space<vmem>>, vector<1x2x72xbf16>
    %5 = vector.shape_cast %4 : vector<1x2x72xbf16> to vector<2x72xbf16>
    %cst_6 = arith.constant dense<0.000000e+00> : vector<2x512xf32>
    %6 = tpu.matmul %5, %0, %cst_6 {dimension_numbers = #tpu.dot_dimension_numbers<[1], [0], [0], [1], [0, 0, 1, 1], [], []>} : vector<2x72xbf16>, vector<72x512xbf16>, vector<2x512xf32> -> vector<2x512xf32>
    %7 = arith.maximumf %3, %6 : vector<2x512xf32>
    %8 = arith.truncf %7 : vector<2x512xf32> to vector<2x512xbf16>
    %c0_7 = arith.constant 0 : index
    %c0_8 = arith.constant 0 : index
    %9 = vector.load %arg3[%c0_7, %c0_8] : memref<512x384xbf16, #tpu.memory_space<vmem>>, vector<512x384xbf16>
    %cst_9 = arith.constant dense<0.000000e+00> : vector<2x384xf32>
    %10 = tpu.matmul %8, %9, %cst_9 {dimension_numbers = #tpu.dot_dimension_numbers<[1], [0], [0], [1], [0, 0, 1, 1], [], []>} : vector<2x512xbf16>, vector<512x384xbf16>, vector<2x384xf32> -> vector<2x384xf32>
    %c0_10 = arith.constant 0 : index
    %c0_11 = arith.constant 0 : index
    %11 = vector.load %arg4[%c0_10, %c0_11] : memref<1x384xf32, #tpu.memory_space<vmem>>, vector<1x384xf32>
    %12 = vector.broadcast %11 : vector<1x384xf32> to vector<2x384xf32>
    %13 = arith.addf %10, %12 : vector<2x384xf32>
    %c0_12 = arith.constant 0 : index
    %c0_13 = arith.constant 0 : index
    %14 = vector.load %arg5[%c0_12, %c0_13] : memref<2x384xf32, #tpu.memory_space<vmem>>, vector<2x384xf32>
    tpu.vector_store %arg5[%c0_12, %c0_13], %13 {strides = array<i32>} : memref<2x384xf32, #tpu.memory_space<vmem>>, vector<2x384xf32>,
    return
  }
  func.func @transform_0(%arg0: i32) -> (i32, i32, i32) {
    %c0_i32 = arith.constant 0 : i32
    %c0_i32_0 = arith.constant 0 : i32
    %c0_i32_1 = arith.constant 0 : i32
    return %c0_i32, %arg0, %c0_i32_0 : i32, i32, i32
  }
  func.func @transform_1(%arg0: i32) -> (i32, i32) {
    %c0_i32 = arith.constant 0 : i32
    %c0_i32_0 = arith.constant 0 : i32
    %c0_i32_1 = arith.constant 0 : i32
    return %c0_i32, %c0_i32_0 : i32, i32
  }
  func.func @transform_2(%arg0: i32) -> (i32, i32) {
    %c0_i32 = arith.constant 0 : i32
    %c0_i32_0 = arith.constant 0 : i32
    %c0_i32_1 = arith.constant 0 : i32
    return %c0_i32, %c0_i32_0 : i32, i32
  }
  func.func @transform_3(%arg0: i32) -> (i32, i32) {
    %c0_i32 = arith.constant 0 : i32
    %c0_i32_0 = arith.constant 0 : i32
    %c0_i32_1 = arith.constant 0 : i32
    return %c0_i32, %c0_i32_0 : i32, i32
  }
  func.func @transform_4(%arg0: i32) -> (i32, i32) {
    %c0_i32 = arith.constant 0 : i32
    %c0_i32_0 = arith.constant 0 : i32
    return %arg0, %c0_i32 : i32, i32
  }
}

</mosaic_0001>

<bundles_post_ra>
// kernel: cnn_forward.1
= control target key start
LH: loop header
LB: loop body
LE: loop exit
PB: predicated region body
PF: predicated region fallthrough
CT: control target
= control target key end

     0   :  { %9 = vsyncpa [#allocation3], 0  ;;  %s1744_s0 = inlined_call_operand.vmem [shape: bf16[2,2,72], index: 0, kind: input, shape index: {}]   ;;  %s1745_s1 = inlined_call_operand.vmem [shape: bf16[72,512], index: 1, kind: input, shape index: {}]   ;;  %s1746_s2 = inlined_call_operand.hbm [shape: bf16[512,384], index: 2, kind: input, shape index: {}]   ;;  %s1747_s3 = inlined_call_operand.vmem [shape: f32[1,384], index: 3, kind: input, shape index: {}]   ;;  %s1748_s4 = inlined_call_operand.hbm [shape: f32[2,384], index: 4, kind: output, shape index: {}]  }
   0x1   :  { %10 = vsyncpa [#allocation4], 0  ;;  %s1576_s15 = smov [#allocation2]   ;;  %s1528_s19 = scalar_lea.hbm %s1746_s2, 12288 }
   0x2   :  { %s20_s16 = sshll.u32 %s1576_s15, 4  ;;  %p1529_p0 = scmp.ne.s32.totalorder %s1746_s2, %s1528_s19  ;;  %s21_s16 = int_to_ptr.vmem [resolvable:$true] %s20_s16 }
   0x3   :  { %p1532_p1 = scmp.lt.u32.totalorder %s1528_s19, %s1746_s2 }
   0x5   :  { %p1534_p2 = pnand %p1532_p1, %p1529_p0 }
   0x7   :  { %1537 = shalt.err (!%p1534_p2)
}
   0x8   :  { %s1538_s24 = scalar_lea.vmem %s21_s16, 12288  ;;  %p1543_p4 = scmp.lt.s32.totalorder %s21_s16, %s21_s16 }
   0x9   :  { %p1539_p3 = scmp.ne.s32.totalorder %s21_s16, %s1538_s24  ;;  %p1544_p5 = scmp.lt.s32.totalorder %s1538_s24, %s1538_s24 }
   0xb   :  { %p1545_p6 = por %p1544_p5, %p1543_p4 }
   0xd   :  { %p1546_p7 = pnand %p1545_p6, %p1539_p3 }
   0xf   :  { %1549 = shalt.err (!%p1546_p7)
}
  0x10   :  { %s1577_s25 = smov 192   ;;  %s1578_s26 = smov 12  }
  0x11   :  { %26 = dma.hbm_to_vmem [thread:$0]  %s1746_s2, 12288, %s21_s16, [#allocation3], %s1577_s25, %s1577_s25, %s1578_s26  }
  0x12   :  { %1572 = dma.done.wait [#allocation3], 12288  }
  0x13   :  { %1573 = vsyncadd [#allocation3], 4294955008  ;;  %v1579_v0 = vmov 0   ;;  %v1623_v1 = vld [vmem:[%s1745_s1 + $0x4] ss:$16 sps:$4 sm:$0xff]   ;;  %vm146_vm0 = vcmask 1043456  }
  0x14   :  { %191 = vmatprep.mubr.bf16.mxu1 %v1579_v0  ;;  %v1628_v2 = vld [vmem:[%s1745_s1] ss:$16 sps:$4 sm:$0xff]   ;;  %159 = vmatprep.subr.bf16.mxu1 %v1623_v1  ;;  %v1634_v3 = vld [vmem:[%s1745_s1 + $0x24] ss:$16 sps:$4 sm:$0xff]   ;;  %v1403_v14 = vld [vmem:[#allocation2 + $0x1c] ss:$12 sps:$4 sm:$0xff]  }
  0x15   :  { %160 = vmatpush1.bf16.msra.mxu1 %v1628_v2  ;;  %v1640_v4 = vld [vmem:[%s1745_s1 + $0x20] ss:$16 sps:$4 sm:$0xff]   ;;  %v1646_v5 = vld [vmem:[%s1745_s1 + $0x44] ss:$16 sps:$4 sm:$0xff]   ;;  %v1388_v15 = vld [vmem:[%s1745_s1 + $0xc] ss:$16 sps:$4 sm:$0xff]  }
  0x16   :  { %161 = vmatprep.subr.bf16.mxu1 %v1634_v3  ;;  %v1652_v6 = vld [vmem:[%s1745_s1 + $0x40] ss:$16 sps:$4 sm:$0xff]   ;;  %v1658_v7 = vld [vmem:[%s1745_s1 + $0x64] ss:$16 sps:$4 sm:$0xff]   ;;  %v1386_v20 = vld [vmem:[%s1745_s1 + $0x8] ss:$16 sps:$4 sm:$0xff]  }
  0x17   :  { %v49_v8 = vld [vmem:[%s1745_s1 + $0x80] sm:$0xff]  ;;  %v1391_v21 = vld [vmem:[%s1745_s1 + $0x2c] ss:$16 sps:$4 sm:$0xff]   ;;  %vm142_vm1 = vcmask 588800   ;;  %v1389_v24 = vld [vmem:[%s1745_s1 + $0x28] ss:$16 sps:$4 sm:$0xff]  }
  0x18   :  { %v1667_v9 = vld [vmem:[%s1745_s1 + $0x60] ss:$16 sps:$4 sm:$0xff]   ;;  %v1670_v10 = vcombine.high %v49_v8, %v49_v8  ;;  %v1207_v11 = vcombine.low %v49_v8, %v49_v8  ;;  %v1405_v16 = vld [vmem:[#allocation2 + $0x18] ss:$12 sps:$4 sm:$0xff]   ;;  %v1394_v25 = vld [vmem:[%s1745_s1 + $0x4c] ss:$16 sps:$4 sm:$0xff]  }
  0x19   :  { %162 = vmatpush1.bf16.msra.mxu1 %v1640_v4  ;;  %v1400_v12 = vld [vmem:[#allocation2 + $0x4] ss:$12 sps:$4 sm:$0xff]   ;;  %v1402_v13 = vld [vmem:[#allocation2] ss:$12 sps:$4 sm:$0xff]   ;;  %v1411_v26 = vld [vmem:[#allocation2 + $0x48] ss:$12 sps:$4 sm:$0xff]  }
  0x1a   :  { %163 = vmatprep.subr.bf16.mxu1 %v1646_v5  ;;  %993 = vmatprep.subr.bf16.mxu0 %v1400_v12  ;;  %v148_v17 = vsel %vm146_vm0, %v1207_v11, 0  ;;  %v1406_v18 = vld [vmem:[#allocation2 + $0x34] ss:$12 sps:$4 sm:$0xff]   ;;  %v1408_v22 = vld [vmem:[#allocation2 + $0x30] ss:$12 sps:$4 sm:$0xff]   ;;  %v50_v31 = vld [vmem:[%s1745_s1 + $0x88] sm:$0xff] }
  0x1b   :  { %994 = vmatpush1.bf16.msra.mxu0 %v1402_v13  ;;  %v51_v19 = vld [vmem:[%s1744_s0] sm:$0x1]  ;;  %v1409_v23 = vld [vmem:[#allocation2 + $0x4c] ss:$12 sps:$4 sm:$0xff]   ;;  %v1412_v27 = vld [vmem:[#allocation2 + $0x64] ss:$12 sps:$4 sm:$0xff]   ;;  %v1210_v33 = vcombine.high %v50_v31, %v50_v31  ;;  %v1209_v34 = vcombine.low %v50_v31, %v50_v31 }
  0x1c   :  { %995 = vmatprep.subr.bf16.mxu0 %v1403_v14  ;;  %v1392_v28 = vld [vmem:[%s1745_s1 + $0x48] ss:$16 sps:$4 sm:$0xff]   ;;  %v1397_v29 = vld [vmem:[%s1745_s1 + $0x6c] ss:$16 sps:$4 sm:$0xff]   ;;  %v1215_v36 = vld [vmem:[%s1744_s0 + $0x1] sm:$0x1] }
  0x1d   :  { %164 = vmatpush1.bf16.msra.mxu1 %v1652_v6  ;;  %v1414_v30 = vld [vmem:[#allocation2 + $0x60] ss:$12 sps:$4 sm:$0xff]   ;;  %v1395_v32 = vld [vmem:[%s1745_s1 + $0x68] ss:$16 sps:$4 sm:$0xff]   ;;  %v154_v35 = vsel %vm146_vm0, %v1209_v34, 0 }
  0x1e   :  { %165 = vmatprep.subr.bf16.mxu1 %v1658_v7  ;;  %v1415_v37 = vld [vmem:[#allocation2 + $0x7c] ss:$12 sps:$4 sm:$0xff]   ;;  %v1417_v38 = vld [vmem:[#allocation2 + $0x78] ss:$12 sps:$4 sm:$0xff]   ;;  %v1418_v39 = vld [vmem:[#allocation2 + $0x94] ss:$12 sps:$4 sm:$0xff]  }
  0x1f   :  { %996 = vmatpush1.bf16.msra.mxu0 %v1405_v16  ;;  %v1420_v40 = vld [vmem:[#allocation2 + $0x90] ss:$12 sps:$4 sm:$0xff]   ;;  %v1421_v41 = vld [vmem:[#allocation2 + $0xac] ss:$12 sps:$4 sm:$0xff]   ;;  %v1426_v42 = vld [vmem:[#allocation2 + $0xc8] ss:$12 sps:$4 sm:$0xff]  }
  0x20   :  { %997 = vmatprep.subr.bf16.mxu0 %v1406_v18  ;;  %v1428_v43 = vld [vmem:[#allocation2 + $0x8] ss:$12 sps:$4 sm:$0xff]   ;;  %v1431_v44 = vld [vmem:[#allocation2 + $0xe0] ss:$12 sps:$4 sm:$0xff]   ;;  %v1424_v47 = vld [vmem:[#allocation2 + $0xc4] ss:$12 sps:$4 sm:$0xff]  }
  0x21   :  { %166 = vmatpush1.bf16.msra.mxu1 %v1667_v9  ;;  %v1423_v45 = vld [vmem:[#allocation2 + $0xa8] ss:$12 sps:$4 sm:$0xff]   ;;  %v1433_v46 = vld [vmem:[#allocation2 + $0x20] ss:$12 sps:$4 sm:$0xff]   ;;  %v1432_v50 = vld [vmem:[#allocation2 + $0xd8] ss:$12 sps:$4 sm:$0xff]  }
  0x22   :  { %1211 = vmatprep.subr.msk.bf16.mxu1 %vm146_vm0, %v1670_v10  ;;  %v1427_v48 = vld [vmem:[#allocation2 + $0xc0] ss:$12 sps:$4 sm:$0xff]   ;;  %v1429_v49 = vld [vmem:[#allocation2 + $0xdc] ss:$12 sps:$4 sm:$0xff]   ;;  %v1436_v52 = vld [vmem:[#allocation2 + $0xf8] ss:$12 sps:$4 sm:$0xff]  }
  0x23   :  { %998 = vmatpush1.bf16.msra.mxu0 %v1408_v22  ;;  %v1434_v51 = vld [vmem:[#allocation2 + $0xf4] ss:$12 sps:$4 sm:$0xff]   ;;  %v1437_v53 = vld [vmem:[#allocation2 + $0xf0] ss:$12 sps:$4 sm:$0xff]   ;;  %v1438_v54 = vld [vmem:[#allocation2 + $0x38] ss:$12 sps:$4 sm:$0xff]  }
  0x24   :  { %999 = vmatprep.subr.bf16.mxu0 %v1409_v23  ;;  %v1439_v55 = vld [vmem:[#allocation2 + $0x10c] ss:$12 sps:$4 sm:$0xff]   ;;  %v1441_v56 = vld [vmem:[#allocation2 + $0x110] ss:$12 sps:$4 sm:$0xff]   ;;  %v1442_v57 = vld [vmem:[#allocation2 + $0x108] ss:$12 sps:$4 sm:$0xff]  }
  0x25   :  { %168 = vmatpush1.bf16.msra.mxu1 %v148_v17  ;;  %v1443_v58 = vld [vmem:[#allocation2 + $0x50] ss:$12 sps:$4 sm:$0xff]   ;;  %v1446_v60 = vld [vmem:[#allocation2 + $0x128] ss:$12 sps:$4 sm:$0xff]   ;;  %v1447_v61 = vld [vmem:[#allocation2 + $0x120] ss:$12 sps:$4 sm:$0xff]  }
  0x26   :  { %200 = vmatprep.subr.bf16.mxu1 %v1388_v15  ;;  %v1444_v59 = vld [vmem:[#allocation2 + $0x124] ss:$12 sps:$4 sm:$0xff]   ;;  %v1448_v62 = vld [vmem:[#allocation2 + $0x68] ss:$12 sps:$4 sm:$0xff]   ;;  %v1473_v34 = vld [vmem:[#allocation2 + $0x1a0] ss:$12 sps:$4 sm:$0xff]  }
  0x27   :  { %1000 = vmatpush1.bf16.msra.mxu0 %v1411_v26  ;;  %v1449_v63 = vld [vmem:[#allocation2 + $0x13c] ss:$12 sps:$4 sm:$0xff]   ;;  %v1466_v11 = vld [vmem:[#allocation2 + $0x184] ss:$12 sps:$4 sm:$0xff]  }
  0x28   :  { %1212 = vmatmul.mubr.msk.bf16.vlgmr.msra.gmra.mrb[0].mxu1 %vm142_vm1, %v51_v19  ;;  %1001 = vmatprep.subr.bf16.mxu0 %v1412_v27  ;;  %v1461_v8 = vld [vmem:[#allocation2 + $0x170] ss:$12 sps:$4 sm:$0xff]   ;;  %v1467_v12 = vld [vmem:[#allocation2 + $0x248] ss:$12 sps:$4 sm:$0xff]  }
  0x29   :  { %201 = vmatpush1.bf16.msra.mxu1 %v1386_v20  ;;  %232 = vmatprep.mubr.bf16.mxu1 %v1579_v0  ;;  %v1471_v31 = vld [vmem:[#allocation2 + $0x19c] ss:$12 sps:$4 sm:$0xff]  }
  0x2a   :  { %202 = vmatprep.subr.bf16.mxu1 %v1391_v21 }
  0x2b   :  { %1002 = vmatpush1.bf16.msra.mxu0 %v1414_v30 }
  0x2c   :  { %1003 = vmatprep.subr.bf16.mxu0 %v1415_v37  ;;  %v1474_v37 = vld [vmem:[#allocation2 + $0x1b0] ss:$12 sps:$4 sm:$0xff]  }
  0x2d   :  { %203 = vmatpush1.bf16.msra.mxu1 %v1389_v24 }
  0x2e   :  { %204 = vmatprep.subr.bf16.mxu1 %v1394_v25 }
  0x2f   :  { %1004 = vmatpush1.bf16.msra.mxu0 %v1417_v38  ;;  %v1478_v38 = vld [vmem:[#allocation2 + $0x1b8] ss:$12 sps:$4 sm:$0xff]  }
  0x30   :  { %1005 = vmatprep.subr.bf16.mxu0 %v1418_v39  ;;  %v1481_v39 = vld [vmem:[#allocation2 + $0x1cc] ss:$12 sps:$4 sm:$0xff]  }
  0x31   :  { %205 = vmatpush1.bf16.msra.mxu1 %v1392_v28 }
  0x32   :  { %206 = vmatprep.subr.bf16.mxu1 %v1397_v29 }
  0x33   :  { %1006 = vmatpush1.bf16.msra.mxu0 %v1420_v40  ;;  %v1482_v40 = vld [vmem:[#allocation2 + $0x290] ss:$12 sps:$4 sm:$0xff]  }
  0x34   :  { %1007 = vmatprep.subr.bf16.mxu0 %v1421_v41  ;;  %v1479_v41 = vld [vmem:[#allocation2 + $0x1c8] ss:$12 sps:$4 sm:$0xff]  }
  0x35   :  { %207 = vmatpush1.bf16.msra.mxu1 %v1395_v32 }
  0x36   :  { %1213 = vmatprep.subr.msk.bf16.mxu1 %vm146_vm0, %v1210_v33 }
  0x37   :  { %1008 = vmatpush1.bf16.msra.mxu0 %v1423_v45 }
  0x38   :  { %1009 = vmatprep.subr.bf16.mxu0 %v1424_v47  ;;  %v1488_v47 = vld [vmem:[#allocation2 + $0x1e8] ss:$12 sps:$4 sm:$0xff]  }
  0x39   :  { %209 = vmatpush1.bf16.msra.mxu1 %v154_v35 }
  0x3a   :  { %246 = vmatprep.subr.bf16.mxu1 %v1623_v1  ;;  %v1452_v1 = vld [vmem:[#allocation2 + $0x138] ss:$12 sps:$4 sm:$0xff]  }
  0x3b   :  { %1010 = vmatpush1.bf16.msra.mxu0 %v1427_v48 }
  0x3c   :  { %1214 = vmatmul.mubr.msk.bf16.vlgmr.msra.gmra.mrb[4].mxu1 %vm142_vm1, %v51_v19  ;;  %1011 = vmatprep.subr.bf16.mxu0 %v1429_v49 }
  0x3d   :  { %247 = vmatpush1.bf16.msra.mxu1 %v1628_v2  ;;  %278 = vmatprep.mubr.bf16.mxu1 %v1579_v0  ;;  %v1453_v2 = vld [vmem:[#allocation2 + $0x80] ss:$12 sps:$4 sm:$0xff]  }
  0x3e   :  { %248 = vmatprep.subr.bf16.mxu1 %v1634_v3  ;;  %v1454_v3 = vld [vmem:[#allocation2 + $0x154] ss:$12 sps:$4 sm:$0xff]  }
  0x3f   :  { %1012 = vmatpush1.bf16.msra.mxu0 %v1432_v50  ;;  %v1491_v50 = vld [vmem:[#allocation2 + $0x1fc] ss:$12 sps:$4 sm:$0xff]  }
  0x40   :  { %1013 = vmatprep.subr.bf16.mxu0 %v1434_v51  ;;  %v1492_v51 = vld [vmem:[#allocation2 + $0x2c0] ss:$12 sps:$4 sm:$0xff]  }
  0x41   :  { %249 = vmatpush1.bf16.msra.mxu1 %v1640_v4  ;;  %v1456_v4 = vld [vmem:[#allocation2 + $0x158] ss:$12 sps:$4 sm:$0xff]  }
  0x42   :  { %250 = vmatprep.subr.bf16.mxu1 %v1646_v5  ;;  %v1457_v5 = vld [vmem:[#allocation2 + $0x150] ss:$12 sps:$4 sm:$0xff]  }
  0x43   :  { %1014 = vmatpush1.bf16.msra.mxu0 %v1437_v53 }
  0x44   :  { %1015 = vmatprep.subr.bf16.mxu0 %v1439_v55 }
  0x45   :  { %251 = vmatpush1.bf16.msra.mxu1 %v1652_v6  ;;  %v1458_v6 = vld [vmem:[#allocation2 + $0x98] ss:$12 sps:$4 sm:$0xff]  }
  0x46   :  { %252 = vmatprep.subr.bf16.mxu1 %v1658_v7  ;;  %v1459_v7 = vld [vmem:[#allocation2 + $0x16c] ss:$12 sps:$4 sm:$0xff]  }
  0x47   :  { %1016 = vmatpush1.bf16.msra.mxu0 %v1442_v57  ;;  %v1493_v57 = vld [vmem:[#allocation2 + $0x200] ss:$12 sps:$4 sm:$0xff]  }
  0x48   :  { %1017 = vmatprep.subr.bf16.mxu0 %v1444_v59  ;;  %v1497_v59 = vld [vmem:[#allocation2 + $0x2d8] ss:$12 sps:$4 sm:$0xff]  }
  0x49   :  { %253 = vmatpush1.bf16.msra.mxu1 %v1667_v9  ;;  %v1462_v9 = vld [vmem:[#allocation2 + $0x168] ss:$12 sps:$4 sm:$0xff]  }
  0x4a   :  { %1216 = vmatprep.subr.msk.bf16.mxu1 %vm146_vm0, %v1670_v10  ;;  %v1463_v10 = vld [vmem:[#allocation2 + $0xb0] ss:$12 sps:$4 sm:$0xff]  }
  0x4b   :  { %1018 = vmatpush1.bf16.msra.mxu0 %v1447_v61  ;;  %v1498_v61 = vld [vmem:[#allocation2 + $0x218] ss:$12 sps:$4 sm:$0xff]  }
  0x4c   :  { %1019 = vmatprep.subr.bf16.mxu0 %v1449_v63  ;;  %v1502_v63 = vld [vmem:[#allocation2 + $0x2f0] ss:$12 sps:$4 sm:$0xff]  }
  0x4d   :  { %255 = vmatpush1.bf16.msra.mxu1 %v148_v17 }
  0x4e   :  { %287 = vmatprep.subr.bf16.mxu1 %v1388_v15 }
  0x4f   :  { %1020 = vmatpush1.bf16.msra.mxu0 %v1452_v1  ;;  %v1503_v1 = vld [vmem:[#allocation2 + $0x230] ss:$12 sps:$4 sm:$0xff]  }
  0x50   :  { %1217 = vmatmul.mubr.msk.bf16.vlgmr.msra.gmra.mrb[8].mxu1 %vm142_vm1, %v1215_v36  ;;  %1021 = vmatprep.subr.bf16.mxu0 %v1454_v3  ;;  %v1504_v3 = vld [vmem:[#allocation2 + $0x240] ss:$12 sps:$4 sm:$0xff]  }
  0x51   :  { %288 = vmatpush1.bf16.msra.mxu1 %v1386_v20  ;;  %319 = vmatprep.mubr.bf16.mxu1 %v1579_v0  ;;  %v1451_v0 = vld [vmem:[#allocation2 + $0x140] ss:$12 sps:$4 sm:$0xff]  }
  0x52   :  { %289 = vmatprep.subr.bf16.mxu1 %v1391_v21 }
  0x53   :  { %1022 = vmatpush1.bf16.msra.mxu0 %v1457_v5  ;;  %v1509_v5 = vld [vmem:[#allocation2 + $0x25c] ss:$12 sps:$4 sm:$0xff]  }
  0x54   :  { %1023 = vmatprep.subr.bf16.mxu0 %v1459_v7  ;;  %v1512_v7 = vld [vmem:[#allocation2 + $0x274] ss:$12 sps:$4 sm:$0xff]  }
  0x55   :  { %290 = vmatpush1.bf16.msra.mxu1 %v1389_v24 }
  0x56   :  { %291 = vmatprep.subr.bf16.mxu1 %v1394_v25 }
  0x57   :  { %1024 = vmatpush1.bf16.msra.mxu0 %v1462_v9  ;;  %v1515_v9 = vld [vmem:[#allocation2 + $0x28c] ss:$12 sps:$4 sm:$0xff]  }
  0x58   :  { %1034 = vmatprep.subr.bf16.mxu0 %v1466_v11  ;;  %v1518_v11 = vld [vmem:[#allocation2 + $0x2a4] ss:$12 sps:$4 sm:$0xff]  }
  0x59   :  { %292 = vmatpush1.bf16.msra.mxu1 %v1392_v28  ;;  %v1464_v28 = vld [vmem:[#allocation2 + $0x180] ss:$12 sps:$4 sm:$0xff]  }
  0x5a   :  { %293 = vmatprep.subr.bf16.mxu1 %v1397_v29  ;;  %v1468_v29 = vld [vmem:[#allocation2 + $0x188] ss:$12 sps:$4 sm:$0xff]  }
  0x5d   :  { %294 = vmatpush1.bf16.msra.mxu1 %v1395_v32  ;;  %v1472_v32 = vld [vmem:[#allocation2 + $0x260] ss:$12 sps:$4 sm:$0xff]  }
  0x5e   :  { %1218 = vmatprep.subr.msk.bf16.mxu1 %vm146_vm0, %v1210_v33  ;;  %v1469_v33 = vld [vmem:[#allocation2 + $0x198] ss:$12 sps:$4 sm:$0xff]  }
  0x61   :  { %296 = vmatpush1.bf16.msra.mxu1 %v154_v35  ;;  %v1476_v35 = vld [vmem:[#allocation2 + $0x1b4] ss:$12 sps:$4 sm:$0xff]  }
  0x62   :  { %1316 = vmatprep.subr.bf16.mxu1 %v1426_v42  ;;  %v1483_v42 = vld [vmem:[#allocation2 + $0x1d0] ss:$12 sps:$4 sm:$0xff]  }
  0x64   :  { %1219 = vmatmul.mubr.msk.bf16.vlgmr.msra.gmra.mrb[12].mxu1 %vm142_vm1, %v1215_v36  ;;  %v1477_v36 = vld [vmem:[#allocation2 + $0x278] ss:$12 sps:$4 sm:$0xff]  }
  0x65   :  { %1317 = vmatpush3.bf16.msra.mxu1 %v1428_v43  ;;  %v1486_v43 = vld [vmem:[#allocation2 + $0x1e4] ss:$12 sps:$4 sm:$0xff]  }
  0x66   :  { %1318 = vmatprep.subr.bf16.mxu1 %v1431_v44  ;;  %v1487_v44 = vld [vmem:[#allocation2 + $0x2a8] ss:$12 sps:$4 sm:$0xff]  }
  0x69   :  { %1319 = vmatpush3.bf16.msra.mxu1 %v1433_v46  ;;  %v1484_v46 = vld [vmem:[#allocation2 + $0x1e0] ss:$12 sps:$4 sm:$0xff]  }
  0x6a   :  { %1320 = vmatprep.subr.bf16.mxu1 %v1436_v52 }
  0x6d   :  { %1321 = vmatpush3.bf16.msra.mxu1 %v1438_v54 }
  0x6e   :  { %1322 = vmatprep.subr.bf16.mxu1 %v1441_v56  ;;  %v1489_v56 = vld [vmem:[#allocation2 + $0x1f8] ss:$12 sps:$4 sm:$0xff]  }
  0x71   :  { %1323 = vmatpush3.bf16.msra.mxu1 %v1443_v58  ;;  %v1496_v58 = vld [vmem:[#allocation2 + $0x214] ss:$12 sps:$4 sm:$0xff]  }
  0x72   :  { %1324 = vmatprep.subr.bf16.mxu1 %v1446_v60  ;;  %v1494_v60 = vld [vmem:[#allocation2 + $0x210] ss:$12 sps:$4 sm:$0xff]  }
  0x75   :  { %1325 = vmatpush3.bf16.msra.mxu1 %v1448_v62  ;;  %v1501_v62 = vld [vmem:[#allocation2 + $0x22c] ss:$12 sps:$4 sm:$0xff]  }
  0x76   :  { %1326 = vmatprep.subr.bf16.mxu1 %v1451_v0  ;;  %v1499_v0 = vld [vmem:[#allocation2 + $0x228] ss:$12 sps:$4 sm:$0xff]  }
  0x79   :  { %1327 = vmatpush3.bf16.msra.mxu1 %v1453_v2  ;;  %v1506_v2 = vld [vmem:[#allocation2 + $0x244] ss:$12 sps:$4 sm:$0xff]  }
  0x7a   :  { %1328 = vmatprep.subr.bf16.mxu1 %v1456_v4 }
  0x7d   :  { %1329 = vmatpush3.bf16.msra.mxu1 %v1458_v6  ;;  %v1507_v6 = vld [vmem:[#allocation2 + $0x258] ss:$12 sps:$4 sm:$0xff]  }
  0x7e   :  { %1330 = vmatprep.subr.bf16.mxu1 %v1461_v8  ;;  %v1510_v8 = vld [vmem:[#allocation2 + $0x270] ss:$12 sps:$4 sm:$0xff]  }
  0x81   :  { %1331 = vmatpush3.bf16.msra.mxu1 %v1463_v10  ;;  %v1513_v10 = vld [vmem:[#allocation2 + $0x288] ss:$12 sps:$4 sm:$0xff]  }
  0x82   :  { %1338 = vmatprep.subr.bf16.mxu1 %v1467_v12  ;;  %v1516_v12 = vld [vmem:[#allocation2 + $0x2a0] ss:$12 sps:$4 sm:$0xff]  }
  0xfb   :  { %v193_v13 = vpop.f32.mrb[0].mxu1 }
  0xfc   :  { %v195_v14 = vpop.f32.mrb[1].mxu1 }
  0xfd   :  { %v197_v15 = vpop.f32.mrb[2].mxu1 }
  0xfe   :  { %v198_v16 = vpop.f32.mrb[3].mxu1  ;;  %v1524_v15 = vld [vmem:[#allocation2 + $0x2d4] ss:$12 sps:$4 sm:$0xff]  }
  0xff   :  { %v1522_v16 = vld [vmem:[#allocation2 + $0x2d0] ss:$12 sps:$4 sm:$0xff]  }
 0x10f   :  { %v234_v17 = vpop.f32.mrb[4].mxu1 }
 0x110   :  { %v236_v18 = vpop.f32.mrb[5].mxu1 }
 0x111   :  { %v238_v19 = vpop.f32.mrb[6].mxu1 }
 0x112   :  { %v239_v20 = vpop.f32.mrb[7].mxu1 }
 0x123   :  { %v280_v21 = vpop.f32.mrb[8].mxu1 }
 0x124   :  { %v328_v22 = vmax.f32 %v193_v13, %v280_v21  ;;  %v282_v23 = vpop.f32.mrb[9].mxu1  ;;  %v1521_v13 = vld [vmem:[#allocation2 + $0x2bc] ss:$12 sps:$4 sm:$0xff]  }
 0x125   :  { %v329_v24 = vmax.f32 %v195_v14, %v282_v23  ;;  %v284_v25 = vpop.f32.mrb[10].mxu1  ;;  %v1519_v14 = vld [vmem:[#allocation2 + $0x2b8] ss:$12 sps:$4 sm:$0xff]  }
 0x126   :  { %v285_v26 = vpop.f32.mrb[11].mxu1  ;;  %v332_v30 = vpack.c.bf16 %v328_v22, %v328_v22 }
 0x127   :  { %v333_v27 = vpack.c.bf16 %v329_v24, %v329_v24  ;;  %v466_v24 = vlaneseq }
 0x129   :  { %1025 = vmatprep.mubr.bf16.mxu0 %v333_v27  ;;  %1107 = vmatprep.mubr.bf16.mxu1 %v333_v27  ;;  %v467_v25 = vshrl.u32 %v466_v24, 7  ;;  %v464_v27 = vld [vmem:[%s1747_s3] sm:$0x7]  ;;  %s1581_s3 = smov [#allocation5]  }
 0x12a   :  { %1026 = vmatmul.mubr.bf16.vlgmr.msra.gmra.mrb[0].mxu0 %v332_v30  ;;  %1108 = vmatmul.mubr.bf16.vlgmr.msra.gmra.mrb[16].mxu1 %v332_v30  ;;  %s1182_s15 = sshll.u32 %s1581_s3, 4  ;;  %s1183_s15 = int_to_ptr.vmem [resolvable:$true] %s1182_s15 }
 0x12b   :  { %1035 = vmatpush1.bf16.msra.mxu0 %v1464_v28  ;;  %1339 = vmatpush3.bf16.msra.mxu1 %v1468_v29  ;;  %v476_v26 = vsub.s32 2, %v467_v25  ;;  %s1550_s16 = scalar_lea.vmem %s1183_s15, 96  ;;  %p1555_p9 = scmp.lt.s32.totalorder %s1183_s15, %s1183_s15 }
 0x12c   :  { %1036 = vmatprep.subr.bf16.mxu0 %v1471_v31  ;;  %1340 = vmatprep.subr.bf16.mxu1 %v1472_v32  ;;  %p1551_p8 = scmp.ne.s32.totalorder %s1183_s15, %s1550_s16  ;;  %p1556_p10 = scmp.lt.s32.totalorder %s1550_s16, %s1550_s16 }
 0x12d   :  { %v477_v28 = vrot.slane %v464_v27, %v476_v26 }
 0x12e   :  { %p1557_p11 = por %p1556_p10, %p1555_p9 }
 0x12f   :  { %1037 = vmatpush1.bf16.msra.mxu0 %v1469_v33  ;;  %1341 = vmatpush3.bf16.msra.mxu1 %v1473_v34 }
 0x130   :  { %1038 = vmatprep.subr.bf16.mxu0 %v1476_v35  ;;  %1342 = vmatprep.subr.bf16.mxu1 %v1477_v36  ;;  %v468_v36 = vsub.s32 0, %v467_v25  ;;  %p1558_p12 = pnand %p1557_p11, %p1551_p8 }
 0x133   :  { %1039 = vmatpush1.bf16.msra.mxu0 %v1474_v37  ;;  %1343 = vmatpush3.bf16.msra.mxu1 %v1478_v38  ;;  %v1580_v37 = vmov 1983009808  }
 0x134   :  { %1040 = vmatprep.subr.bf16.mxu0 %v1481_v39  ;;  %1344 = vmatprep.subr.bf16.mxu1 %v1482_v40  ;;  %v1160_v38 = vunpack.c.l.s4 %v1580_v37  ;;  %v472_v39 = vsub.s32 1, %v467_v25  ;;  %v469_v40 = vrot.slane %v464_v27, %v468_v36 }
 0x137   :  { %1041 = vmatpush1.bf16.msra.mxu0 %v1479_v41  ;;  %1345 = vmatpush3.bf16.msra.mxu1 %v1483_v42  ;;  %v321_v45 = vpop.f32.mrb[12].mxu1  ;;  %v1161_v41 = vunpack.c.0.s8 %v1160_v38  ;;  %v473_v42 = vrot.slane %v464_v27, %v472_v39 }
 0x138   :  { %v330_v48 = vmax.f32 %v234_v17, %v321_v45  ;;  %v323_v49 = vpop.f32.mrb[13].mxu1  ;;  %1042 = vmatprep.subr.bf16.mxu0 %v1486_v43  ;;  %1346 = vmatprep.subr.bf16.mxu1 %v1487_v44  ;;  %v1527_v17 = vld [vmem:[#allocation2 + $0x2ec] ss:$12 sps:$4 sm:$0xff]  }
 0x139   :  { %v331_v52 = vmax.f32 %v236_v18, %v323_v49  ;;  %v325_v53 = vpop.f32.mrb[14].mxu1  ;;  %v1525_v18 = vld [vmem:[#allocation2 + $0x2e8] ss:$12 sps:$4 sm:$0xff]  }
 0x13a   :  { %v326_v54 = vpop.f32.mrb[15].mxu1  ;;  %v334_v4 = vpack.c.bf16 %v330_v48, %v330_v48 }
 0x13b   :  { %v335_v55 = vpack.c.bf16 %v331_v52, %v331_v52  ;;  %1043 = vmatpush1.bf16.msra.mxu0 %v1484_v46  ;;  %1347 = vmatpush3.bf16.msra.mxu1 %v1488_v47  ;;  %v1164_v46 = vsub.s32 %v1161_v41, %v467_v25 }
 0x13c   :  { %1044 = vmatprep.subr.bf16.mxu0 %v1491_v50  ;;  %1348 = vmatprep.subr.bf16.mxu1 %v1492_v51 }
 0x13d   :  { %1066 = vmatprep.mubr.bf16.mxu0 %v335_v55  ;;  %1147 = vmatprep.mubr.bf16.mxu1 %v335_v55 }
 0x13f   :  { %1045 = vmatpush1.bf16.msra.mxu0 %v1489_v56  ;;  %1349 = vmatpush3.bf16.msra.mxu1 %v1493_v57 }
 0x140   :  { %1046 = vmatprep.subr.bf16.mxu0 %v1496_v58  ;;  %1350 = vmatprep.subr.bf16.mxu1 %v1497_v59 }
 0x143   :  { %1047 = vmatpush1.bf16.msra.mxu0 %v1494_v60  ;;  %1351 = vmatpush3.bf16.msra.mxu1 %v1498_v61 }
 0x144   :  { %1048 = vmatprep.subr.bf16.mxu0 %v1501_v62  ;;  %1352 = vmatprep.subr.bf16.mxu1 %v1502_v63 }
 0x147   :  { %1049 = vmatpush1.bf16.msra.mxu0 %v1499_v0  ;;  %1353 = vmatpush3.bf16.msra.mxu1 %v1503_v1 }
 0x148   :  { %1050 = vmatprep.subr.bf16.mxu0 %v1506_v2 }
 0x14a   :  { %1148 = vmatmul.mubr.bf16.vlgmr.msra.gmra.mrb[20].mxu1 %v334_v4 }
 0x14b   :  { %1051 = vmatpush1.bf16.msra.mxu0 %v1504_v3 }
 0x14c   :  { %1052 = vmatprep.subr.bf16.mxu0 %v1509_v5 }
 0x14f   :  { %1053 = vmatpush1.bf16.msra.mxu0 %v1507_v6 }
 0x150   :  { %1054 = vmatprep.subr.bf16.mxu0 %v1512_v7 }
 0x153   :  { %1055 = vmatpush1.bf16.msra.mxu0 %v1510_v8 }
 0x154   :  { %1056 = vmatprep.subr.bf16.mxu0 %v1515_v9 }
 0x157   :  { %1057 = vmatpush1.bf16.msra.mxu0 %v1513_v10 }
 0x158   :  { %1058 = vmatprep.subr.bf16.mxu0 %v1518_v11 }
 0x15b   :  { %1059 = vmatpush1.bf16.msra.mxu0 %v1516_v12 }
 0x15c   :  { %1060 = vmatprep.subr.bf16.mxu0 %v1521_v13 }
 0x15f   :  { %1061 = vmatpush1.bf16.msra.mxu0 %v1519_v14 }
 0x160   :  { %1062 = vmatprep.subr.bf16.mxu0 %v1524_v15 }
 0x163   :  { %1063 = vmatpush1.bf16.msra.mxu0 %v1522_v16 }
 0x164   :  { %1064 = vmatprep.subr.bf16.mxu0 %v1527_v17 }
 0x167   :  { %1065 = vmatpush1.bf16.msra.mxu0 %v1525_v18 }
 0x16a   :  { %1067 = vmatmul.mubr.bf16.vlgmr.msra.gmra.mrb[0].mxu0 %v334_v4 }
 0x1fd   :  { %v1332_v19 = vpop.f32.mrb[16].mxu1 }
 0x1fe   :  { %v1333_v20 = vpop.f32.mrb[17].mxu1 }
 0x1ff   :  { %v1334_v21 = vadd.f32 %v1333_v20, %v1332_v19  ;;  %v1335_v22 = vpop.f32.mrb[18].mxu1 }
 0x200   :  { %v1336_v23 = vpop.f32.mrb[19].mxu1 }
 0x201   :  { %v1110_v31 = vadd.f32 %v1334_v21, %v477_v28 }
 0x21d   :  { %v1354_v29 = vpop.f32.mrb[20].mxu1 }
 0x21e   :  { %v1355_v30 = vpop.f32.mrb[21].mxu1 }
 0x21f   :  { %v1356_v32 = vadd.f32 %v1355_v30, %v1354_v29  ;;  %v1357_v33 = vpop.f32.mrb[22].mxu1 }
 0x220   :  { %v1358_v34 = vpop.f32.mrb[23].mxu1 }
 0x221   :  { %v1150_v35 = vadd.f32 %v1356_v32, %v1110_v31 }
 0x223   :  { %v1172_v51 = vrot.slane %v1150_v35, %v1164_v46 }
 0x23d   :  { %v1068_v43 = vpop.f32.mrb[0].mxu0 }
 0x23e   :  { %v1360_v44 = vadd.f32 %v1068_v43, %v469_v40  ;;  %v1070_v45 = vpop.f32.mrb[1].mxu0 }
 0x23f   :  { %v1361_v47 = vadd.f32 %v1070_v45, %v473_v42  ;;  %v1072_v48 = vpop.f32.mrb[2].mxu0 }
 0x240   :  { %v1073_v49 = vpop.f32.mrb[3].mxu0 }
 0x241   :  { %v1158_v50 = vcombine.low %v1360_v44, %v1361_v47 }
 0x243   :  { %v1165_v52 = vrot.slane %v1158_v50, %v1164_v46 }
 0x245   :  { %v1173_v53 = vcombine.low %v1165_v52, %v1172_v51 }
 0x247   :  { %1175 = vst [vmem:[#allocation5] sm:$0x3f] %v1173_v53 }
 0x248   :  { %1561 = shalt.err (!%p1558_p12)
}
 0x249   :  { %s1562_s19 = scalar_lea.hbm %s1748_s4, 96 }
 0x24a   :  { %p1563_p13 = scmp.ne.s32.totalorder %s1748_s4, %s1562_s19  ;;  %p1566_p0 = scmp.lt.u32.totalorder %s1562_s19, %s1748_s4 }
 0x24c   :  { %p1568_p1 = pnand %p1566_p0, %p1563_p13 }
 0x24e   :  { %1571 = shalt.err (!%p1568_p1)
}
 0x24f   :  { %1185 = dma.vmem_to_hbm [thread:$0]  %s1183_s15, 96, %s1748_s4, [#allocation4]  }
 0x250   :  { %1574 = dma.done.wait [#allocation4], 96  }
 0x251   :  { %1575 = vsyncadd [#allocation4], 4294967200 }
 0x252   :  { %1189 = vsyncpa [#allocation3], 1 }
 0x253   :  { %1190 = vsyncpa [#allocation4], 1 }

</bundles_post_ra>
